<compile_context>
chip_gen: v7x
topology: tpu7x:2x2x1
jax: 0.10.0
libtpu: 0.0.40
codegen_flags: <defaults>
</compile_context>

<pallas_src>
import jax
import jax.numpy as jnp
from jax.experimental import pallas as pl
from jax.experimental.pallas import tpu as pltpu


def _fusion_attn_kernel(x_ref, a_ref, o_ref):
    # Blocks: x (1, T, N), a (1, N, N), o (1, T, N); N is the 128-lane axis.
    x = x_ref[0].astype(jnp.float32)                                   # (T, N)
    a = a_ref[0].astype(jnp.float32)                                   # (N, N)

    s = jnp.tanh(jnp.dot(x, a, preferred_element_type=jnp.float32))    # (T, N)

    # tanh output is in (-1, 1) so exp(s) is in (1/e, e): no max-shift needed.
    e = jnp.exp(s)
    denom = jnp.sum(e, axis=-1, keepdims=True)                         # (T, 1)
    p = e * pl.reciprocal(denom, approx=True)                          # softmax over N

    o_ref[0] = (p * x).astype(o_ref.dtype)


def fusion_attention_pallas(x, corr):
    """out[b] = softmax(tanh(x[b] @ corr[b]), axis=-1) * x[b], fused on TPU."""
    B, T, N = x.shape
    assert corr.shape == (B, N, N)

    cost = pl.CostEstimate(
        flops=int(B * (2 * T * N * N + 5 * T * N)),
        transcendentals=int(2 * B * T * N),          # tanh + exp per element
        bytes_accessed=int(4 * (2 * x.size + corr.size)),
    )
    return pl.pallas_call(
        _fusion_attn_kernel,
        out_shape=jax.ShapeDtypeStruct((B, T, N), x.dtype),
        grid_spec=pltpu.PrefetchScalarGridSpec(
            num_scalar_prefetch=0,
            grid=(B,),                               # >=2 parallel steps (v7x megacore)
            in_specs=[pl.BlockSpec((1, T, N), lambda i: (i, 0, 0)),
                      pl.BlockSpec((1, N, N), lambda i: (i, 0, 0))],
            out_specs=pl.BlockSpec((1, T, N), lambda i: (i, 0, 0)),
        ),
        compiler_params=pltpu.CompilerParams(
            dimension_semantics=("parallel",)),
        cost_estimate=cost,
    )(x, corr)


def _corrcoef(m):
    """numpy-compatible corrcoef for a 2-D (variables x observations) matrix."""
    m = m.astype(jnp.float32)
    xm = m - jnp.mean(m, axis=1, keepdims=True)
    fact = float(max(m.shape[1] - 1, 0))             # numpy clamps dof<=0 to 0 -> NaN
    c = (xm @ xm.T) / fact
    d = jnp.sqrt(jnp.diag(c))
    c = c / d[:, None] / d[None, :]
    return jnp.clip(c, -1.0, 1.0)


class ModelFusionPallas:
    """JAX/Pallas port of Model_fusion (only the ops its forward() actually uses)."""

    def __init__(self, hidden_dim, input_dim, layer_dim, gate_type, qz_para_dim):
        self.hidden_dim = hidden_dim
        self.layer_dim = layer_dim
        self.attn_dim = hidden_dim
        self.in_steps = 20
        self.num_nodes = input_dim
        self.model_dim = hidden_dim
        self.input_dim = input_dim
        self.head_dim = hidden_dim // 28
        # TODO(synk): attn_layers_t / fc_q / input_proj / output_proj are dead code in
        # the reference Model_fusion.forward() and are therefore omitted here.

    def __call__(self, x, att1):
        B, T, N = x.shape
        assert att1.shape == (B, N)
        # TODO(synk): the reference computes np.corrcoef(att1[i].unsqueeze(1)) on the
        # host; with a single observation per row this is NaN by definition — done in
        # plain JAX here (not a Pallas op), reproducing numpy's behavior exactly.
        corr = jax.vmap(lambda a: _corrcoef(a[:, None]))(att1)       # (B, N, N)
        return fusion_attention_pallas(x, corr)


def _reference(x, corr):
    s = jnp.tanh(jnp.einsum("btn,bnm->btm", x, corr))
    p = jax.nn.softmax(s, axis=-1)
    return p * x


if __name__ == "__main__":
    # Small shapes consistent with the module: batch=2, T (time steps)=16,
    # N (num_nodes)=128 so the trailing dim is lane-dense.
    B, T, N = 2, 16, 128
    key0 = jax.random.PRNGKey(0)
    kx, ka, ko = jax.random.split(key0, 3)
    x = jax.random.normal(kx, (B, T, N), jnp.float32)
    att1 = jax.random.normal(ka, (B, N), jnp.float32)

    # 1) Validate the fused kernel math against pure JAX using well-posed
    #    (finite) correlation matrices built from a multi-observation series.
    obs = jax.random.normal(ko, (B, N, 8), jnp.float32)
    corr_fin = jax.vmap(_corrcoef)(obs)                               # finite (B, N, N)
    out_fin = jax.block_until_ready(fusion_attention_pallas(x, corr_fin))
    ref_fin = _reference(x, corr_fin)
    assert out_fin.shape == (B, T, N), out_fin.shape
    assert bool(jnp.allclose(out_fin, ref_fin, atol=2e-3, rtol=2e-3)), \
        "kernel mismatch vs JAX reference"

    # 2) Run the faithful Model_fusion.forward path (single-observation corrcoef
    #    is NaN in the reference too; we only require exact NaN-for-NaN agreement).
    model = ModelFusionPallas(hidden_dim=32, input_dim=N, layer_dim=1,
                              gate_type=None, qz_para_dim=4)
    out = jax.block_until_ready(model(x, att1))
    corr_ref = jax.vmap(lambda a: _corrcoef(a[:, None]))(att1)
    ref = _reference(x, corr_ref)
    assert out.shape == (B, T, N), out.shape
    assert bool(jnp.allclose(out, ref, atol=2e-3, rtol=2e-3, equal_nan=True)), \
        "model mismatch vs JAX reference"

    print("KERNEL_OK")
</pallas_src>

<mosaic_0001>
module attributes {stable_mosaic.version = 11 : i64} {
  func.func @_fusion_attn_kernel(%arg0: i32, %arg1: memref<1x16x128xf32, #tpu.memory_space<vmem>>, %arg2: memref<1x128x128xf32, #tpu.memory_space<vmem>>, %arg3: memref<1x16x128xf32, #tpu.memory_space<vmem>>) attributes {dimension_semantics = [#tpu.dimension_semantics<parallel>], iteration_bounds = array<i64: 2>, scalar_prefetch = 0 : i64, scratch_operands = 0 : i64, tpu.core_type = #tpu.core_type<tc>, window_params = [{transform_indices = @transform_0, window_bounds = array<i64: 1, 16, 128>}, {transform_indices = @transform_1, window_bounds = array<i64: 1, 128, 128>}, {transform_indices = @transform_2, window_bounds = array<i64: 1, 16, 128>}]} {
    %c0 = arith.constant 0 : index
    %c0_0 = arith.constant 0 : index
    %c0_1 = arith.constant 0 : index
    %0 = vector.load %arg1[%c0, %c0_0, %c0_1] : memref<1x16x128xf32, #tpu.memory_space<vmem>>, vector<1x16x128xf32>
    %1 = vector.shape_cast %0 : vector<1x16x128xf32> to vector<16x128xf32>
    %c0_2 = arith.constant 0 : index
    %c0_3 = arith.constant 0 : index
    %c0_4 = arith.constant 0 : index
    %2 = vector.load %arg2[%c0_2, %c0_3, %c0_4] : memref<1x128x128xf32, #tpu.memory_space<vmem>>, vector<1x128x128xf32>
    %3 = vector.shape_cast %2 : vector<1x128x128xf32> to vector<128x128xf32>
    %cst = arith.constant dense<0.000000e+00> : vector<16x128xf32>
    %4 = tpu.matmul %1, %3, %cst {dimension_numbers = #tpu.dot_dimension_numbers<[1], [0], [0], [1], [0, 0, 1, 1], [], []>} : vector<16x128xf32>, vector<128x128xf32>, vector<16x128xf32> -> vector<16x128xf32>
    %5 = math.tanh %4 : vector<16x128xf32>
    %6 = math.exp %5 : vector<16x128xf32>
    %cst_5 = arith.constant dense<0.000000e+00> : vector<16xf32>
    %7 = vector.multi_reduction <add>, %6, %cst_5 [1] : vector<16x128xf32> to vector<16xf32>
    %8 = vector.shape_cast %7 : vector<16xf32> to vector<16x1xf32>
    %9 = tpu.reciprocal %8 {approx = true} : vector<16x1xf32> -> vector<16x1xf32>
    %10 = vector.broadcast %9 : vector<16x1xf32> to vector<16x128xf32>
    %11 = arith.mulf %6, %10 : vector<16x128xf32>
    %12 = arith.mulf %11, %1 : vector<16x128xf32>
    %c0_6 = arith.constant 0 : index
    %c0_7 = arith.constant 0 : index
    %c0_8 = arith.constant 0 : index
    %13 = vector.load %arg3[%c0_6, %c0_7, %c0_8] : memref<1x16x128xf32, #tpu.memory_space<vmem>>, vector<1x16x128xf32>
    %14 = vector.shape_cast %13 : vector<1x16x128xf32> to vector<16x128xf32>
    %15 = vector.shape_cast %12 : vector<16x128xf32> to vector<1x16x128xf32>
    tpu.vector_store %arg3[%c0_6, %c0_7, %c0_8], %15 {strides = array<i32>} : memref<1x16x128xf32, #tpu.memory_space<vmem>>, vector<1x16x128xf32>,
    return
  }
  func.func @transform_0(%arg0: i32) -> (i32, i32, i32) {
    %c0_i32 = arith.constant 0 : i32
    %c0_i32_0 = arith.constant 0 : i32
    %c0_i32_1 = arith.constant 0 : i32
    return %arg0, %c0_i32, %c0_i32_0 : i32, i32, i32
  }
  func.func @transform_1(%arg0: i32) -> (i32, i32, i32) {
    %c0_i32 = arith.constant 0 : i32
    %c0_i32_0 = arith.constant 0 : i32
    %c0_i32_1 = arith.constant 0 : i32
    return %arg0, %c0_i32, %c0_i32_0 : i32, i32, i32
  }
  func.func @transform_2(%arg0: i32) -> (i32, i32, i32) {
    %c0_i32 = arith.constant 0 : i32
    %c0_i32_0 = arith.constant 0 : i32
    %c0_i32_1 = arith.constant 0 : i32
    return %arg0, %c0_i32, %c0_i32_0 : i32, i32, i32
  }
}

</mosaic_0001>

<bundles_post_ra>
// kernel: tpu_custom_call.1
= control target key start
LH: loop header
LB: loop body
LE: loop exit
PB: predicated region body
PF: predicated region fallthrough
CT: control target
= control target key end

     0   :  { %7 = vsyncpa [#allocation3], 0  ;;  %s994_s0 = inlined_call_operand.hbm [shape: f32[2,16,128], index: 0, kind: input, shape index: {}]   ;;  %s995_s1 = inlined_call_operand.hbm [shape: f32[2,128,128], index: 1, kind: input, shape index: {}]   ;;  %s996_s2 = inlined_call_operand.hbm [shape: f32[2,16,128], index: 2, kind: output, shape index: {}]  }
   0x1   :  { %9 = vsyncpa [#allocation3 + $0x1], 0 }
   0x2   :  { %10 = vsyncpa [#allocation6], 0 }
   0x3   :  { %12 = vsyncpa [#allocation6 + $0x1], 0 }
   0x4   :  { %13 = vsyncpa [#allocation4], 0 }
   0x5   :  { %15 = vsyncpa [#allocation4 + $0x1], 0  ;;  %s750_s9 = smov 0   ;;  %s752_s10 = smov 0  }
   0x6   :  { %s754_s11 = smov 0   ;;  %s756_s12 = smov 0  }
   0x7 LB: > { %s771_s13 = sadd.s32 4294967295, %s726_s12   ;;  %s423_s14 = sadd.s32 4294967294, %s726_s12   ;;  %s726_s12 = sphi %s756_s12, %s1012_s12   ;;  %s722_s11 = sphi %s754_s11, %s1011_s11   ;;  %s718_s10 = sphi %s752_s10, %s1010_s10   ;;  %s714_s9 = sphi %s750_s9, %s1009_s9  }
   0x8   : > { %s775_s15 = sadd.s32 1, %s726_s12   ;;  %s28_s16 = sadd.s32 1, %s722_s11 }
   0x9   : > { %s25_s17 = ssub.s32 %s726_s12, %s775_s15  ;;  %p35_p0 = scmp.ne.s32.totalorder %s722_s11, %s718_s10 }
   0xa   : > { %p26_p1 = scmp.eq.s32.totalorder %s25_s17, 0  ;;  %p36_p2 = scmp.eq.s32.totalorder %s726_s12, 0 }
   0xb   : > { %p41_p3 = scmp.ne.s32.totalorder %s718_s10, %s714_s9  ;;  %p42_p4 = scmp.eq.s32.totalorder %s771_s13, 0 }
   0xc   : > { %s787_s18 = scalar_select %p26_p1, %s722_s11, %s28_s16  }
   0xd   : > { %p789_p5 = por %p36_p2, %p35_p0  ;;  %p793_p6 = por %p42_p4, %p41_p3 }
   0xe   : > { %p91_p7 = scmp.eq.s32.totalorder %s771_s13, 1  ;;  %p97_p8 = scmp.eq.s32.totalorder %s423_s14, 1 }
   0xf   : > { %s1000_s20 = scalar_select %p793_p6, 1, 0 }
  0x10   : > { %p546_p10 = scmp.lt.s32.totalorder %s726_s12, 2  ;;  %p800_p11 = por %p91_p7, %p35_p0 }
  0x11   : > { %p804_p12 = por %p97_p8, %p41_p3  ;;  %s809_s23 = sand.u32 1, %s722_s11  }
  0x12   : > { %s1001_s21 = scalar_select %p800_p11, 1, 0 }
  0x13   : > { %s1002_s22 = scalar_select %p804_p12, 1, 0 }
  0x14   : > { %s441_s24 = sshll.u32 %s726_s12, 8  ;;  %s426_s25 = sshll.u32 %s809_s23, 4 }
  0x15   : > { %s816_s28 = scalar_lea.hbm %s994_s0, %s441_s24  ;;  %s121_s29 = scalar_lea.vmem [#allocation2], %s426_s25 }
  0x16   : > { %s128_s30 = sshll.u32 %s121_s29, 4  ;;  %p820_p13 = pnand %p546_p10, %p789_p5  ;;  %s824_s30 = int_to_ptr.vmem [resolvable:$true] %s128_s30 }
  0x17   : > { %s118_s4 = scalar_lea.sflag [#allocation3], %s809_s23  ;;  %s596_s5 = scalar_lea.hbm %s816_s28, 256 }
  0x18   : > { %p597_p0 = scmp.ne.s32.totalorder %s816_s28, %s596_s5  ;;  %p598_p1 = pneg %p820_p13 }
  0x19   : > { %s601_s8 = scalar_lea.hbm %s994_s0, 512  ;;  %p602_p4 = scmp.lt.u32.totalorder %s816_s28, %s994_s0 }
  0x1a   : > { %p599_p2 = pnand %p598_p1, %p597_p0  ;;  %p603_p5 = scmp.lt.u32.totalorder %s601_s8, %s596_s5 }
  0x1b   : > { %p605_p8 = scmp.lt.u32.totalorder %s596_s5, %s816_s28 }
  0x1c   : > { %p600_p3 = pneg %p599_p2  ;;  %p604_p7 = por %p603_p5, %p602_p4 }
  0x1e   : > { %p606_p10 = por %p605_p8, %p604_p7 }
  0x20   : > { %p607_p9 = pnand %p606_p10, %p600_p3 }
  0x22   : > { %610 = shalt.err (!%p607_p9)
}
  0x23   : > { %s611_s17 = scalar_lea.vmem %s824_s30, 256  ;;  %s728_s19 = smov [#allocation2]  }
  0x24   : > { %p612_p0 = scmp.ne.s32.totalorder %s824_s30, %s611_s17  ;;  %s616_s24 = sshll.u32 %s728_s19, 4  ;;  %s617_s24 = int_to_ptr.vmem [resolvable:$false] %s616_s24 }
  0x25   : > { %s618_s25 = scalar_lea.vmem %s617_s24, 512  ;;  %p619_p11 = scmp.lt.s32.totalorder %s824_s30, %s617_s24 }
  0x26   : > { %p614_p2 = pnand %p612_p0, %p598_p1  ;;  %p620_p4 = scmp.lt.s32.totalorder %s618_s25, %s611_s17 }
  0x28   : > { %p615_p12 = pneg %p614_p2  ;;  %p621_p5 = por %p620_p4, %p619_p11 }
  0x2a   : > { %p622_p7 = pnand %p621_p5, %p615_p12 }
  0x2c   : > { %625 = shalt.err (!%p622_p7)
}
  0x2d   : > { %s729_s26 = smov 128   ;;  %s730_s27 = smov 8  }
  0x2e   : > { %538 = dma.hbm_to_vmem [thread:$0]  (!%p820_p13), %s816_s28, 256, %s824_s30, %s118_s4, %s729_s26, %s729_s26, %s730_s27  }
  0x2f   : > { %p432_p9 = scmp.ge.s32.totalorder %s726_s12, 1  ;;  %p157_p11 = scmp.lt.s32.totalorder %s726_s12, 3 }
  0x30   : > { %s429_s29 = sshll.u32 %s809_s23, 7  ;;  %s442_s6 = sshll.u32 %s726_s12, 11 }
  0x31   : > { %p860_p12 = pnand %p432_p9, %p157_p11  ;;  %s142_s7 = scalar_lea.vmem [#allocation5], %s429_s29 }
  0x32   : > { %s149_s8 = sshll.u32 %s142_s7, 4  ;;  %s868_s17 = scalar_lea.hbm %s995_s1, %s442_s6  ;;  %s870_s8 = int_to_ptr.vmem [resolvable:$true] %s149_s8 }
  0x33   : > { %s139_s28 = scalar_lea.sflag [#allocation6], %s809_s23  ;;  %s626_s30 = scalar_lea.hbm %s868_s17, 2048 }
  0x34   : > { %p627_p3 = scmp.ne.s32.totalorder %s868_s17, %s626_s30  ;;  %s631_s24 = scalar_lea.hbm %s995_s1, 4096 }
  0x35   : > { %p632_p0 = scmp.lt.u32.totalorder %s868_s17, %s995_s1  ;;  %p633_p2 = scmp.lt.u32.totalorder %s631_s24, %s626_s30 }
  0x36   : > { %p629_p8 = pnand %p627_p3, %p598_p1  ;;  %p635_p5 = scmp.lt.u32.totalorder %s626_s30, %s868_s17 }
  0x37   : > { %p634_p4 = por %p633_p2, %p632_p0 }
  0x38   : > { %p630_p10 = pneg %p629_p8 }
  0x39   : > { %p636_p7 = por %p635_p5, %p634_p4 }
  0x3b   : > { %p637_p9 = pnand %p636_p7, %p630_p10 }
  0x3d   : > { %640 = shalt.err (!%p637_p9)
}
  0x3e   : > { %s641_s6 = scalar_lea.vmem %s870_s8, 2048  ;;  %s731_s7 = smov [#allocation5]  }
  0x3f   : > { %p642_p11 = scmp.ne.s32.totalorder %s870_s8, %s641_s6  ;;  %s646_s14 = sshll.u32 %s731_s7, 4  ;;  %s647_s14 = int_to_ptr.vmem [resolvable:$false] %s646_s14 }
  0x40   : > { %s648_s16 = scalar_lea.vmem %s647_s14, 4096  ;;  %p649_p6 = scmp.lt.s32.totalorder %s870_s8, %s647_s14 }
  0x41   : > { %p644_p3 = pnand %p642_p11, %p598_p1  ;;  %p650_p0 = scmp.lt.s32.totalorder %s648_s16, %s641_s6 }
  0x43   : > { %p645_p8 = pneg %p644_p3  ;;  %p651_p2 = por %p650_p0, %p649_p6 }
  0x45   : > { %p652_p4 = pnand %p651_p2, %p645_p8 }
  0x47   : > { %655 = shalt.err (!%p652_p4)
}
  0x48   : > { %541 = dma.hbm_to_vmem [thread:$0]  (!%p820_p13), %s868_s17, 2048, %s870_s8, %s139_s28, %s729_s26, %s729_s26, %s730_s27  }
  0x49   : > { %161 = sbr.rel (%p860_p12) target bundleno = 532 (0x214), region = 28  ;;  %s904_s30 = sand.u32 (!%p860_p12), 1, %s718_s10  }
  0x4a   : > { %s433_s4 = sshll.u32 (!%p860_p12), %s904_s30, 4  ;;  %s164_s3 = scalar_lea.sflag (!%p860_p12), [#allocation3], %s904_s30 }
  0x4b   : > { %s910_s19 = scalar_lea.vmem (!%p860_p12), [#allocation2], %s433_s4  ;;  %p1005_p6 = scmp.ne.s32.totalorder (!%p860_p12), %s1000_s20, 0 }
  0x50   : > { %701 = dma.done.wait (%p1005_p6), %s164_s3, 256  }
  0x51   : > { %703 = vsyncadd (%p1005_p6), %s164_s3, 4294967040  ;;  %s434_s23 = sshll.u32 %s904_s30, 7  ;;  %s173_s26 = scalar_lea.sflag [#allocation6], %s904_s30 }
  0x52   : > { %s918_s27 = scalar_lea.vmem [#allocation5], %s434_s23 }
  0x53   : > { %705 = dma.done.wait (%p1005_p6), %s173_s26, 2048  }
  0x54   : > { %707 = vsyncadd (%p1005_p6), %s173_s26, 4294965248  ;;  %v204_v0 = vld [vmem:[%s918_s27] sm:$0xff]  ;;  %v205_v1 = vld [vmem:[%s918_s27 + $0x8] sm:$0xff]  ;;  %s443_s20 = sshll.u32 %s771_s13, 8  ;;  %s201_s5 = scalar_lea.vmem [#allocation7], %s433_s4 }
  0x55   : > { %v206_v2 = vld [vmem:[%s918_s27 + $0x10] sm:$0xff]  ;;  %v497_v3 = vpack.c.bf16 %v205_v1, %v204_v0  ;;  %v207_v4 = vld [vmem:[%s918_s27 + $0x18] sm:$0xff]  ;;  %v208_v6 = vld [vmem:[%s918_s27 + $0x20] sm:$0xff]  ;;  %s327_s8 = sshll.u32 %s201_s5, 4  ;;  %s948_s24 = scalar_lea.hbm %s996_s2, %s443_s20  ;;  %s950_s8 = int_to_ptr.vmem [resolvable:$true] %s327_s8 }
  0x56   : > { %v501_v5 = vpack.c.bf16 %v207_v4, %v206_v2  ;;  %v209_v7 = vld [vmem:[%s918_s27 + $0x28] sm:$0xff]  ;;  %v202_v9 = vld [vmem:[%s910_s19] sm:$0xff]  ;;  %v211_v11 = vld [vmem:[%s918_s27 + $0x38] sm:$0xff]  ;;  %s314_s25 = scalar_lea.sflag [#allocation4], %s904_s30  ;;  %s656_s13 = scalar_lea.vmem %s950_s8, 256 }
  0x57   : > { %498 = vmatprep.subr.bf16.mxu0 %v497_v3  ;;  %v505_v8 = vpack.c.bf16 %v209_v7, %v208_v6  ;;  %v210_v10 = vld [vmem:[%s918_s27 + $0x30] sm:$0xff]  ;;  %494 = vmatprep.mubr.f32.mxu0 %v202_v9  ;;  %v212_v13 = vld [vmem:[%s918_s27 + $0x40] sm:$0xff]  ;;  %v213_v14 = vld [vmem:[%s918_s27 + $0x48] sm:$0xff]  ;;  %p657_p13 = scmp.ne.s32.totalorder %s950_s8, %s656_s13  ;;  %p1006_p1 = scmp.ne.s32.totalorder %s1001_s21, 0 }
  0x58   : > { %500 = vmatpush3.bf16.msra.mxu0 %v497_v3  ;;  %v509_v12 = vpack.c.bf16 %v211_v11, %v210_v10  ;;  %v513_v15 = vpack.c.bf16 %v213_v14, %v212_v13  ;;  %v214_v16 = vld [vmem:[%s918_s27 + $0x50] sm:$0xff]  ;;  %v215_v17 = vld [vmem:[%s918_s27 + $0x58] sm:$0xff]  ;;  %v216_v19 = vld [vmem:[%s918_s27 + $0x60] sm:$0xff]  ;;  %s732_s29 = smov [#allocation7]  }
  0x59   : > { %502 = vmatprep.subr.bf16.mxu0 %v501_v5  ;;  %v517_v18 = vpack.c.bf16 %v215_v17, %v214_v16  ;;  %v217_v20 = vld [vmem:[%s918_s27 + $0x68] sm:$0xff]  ;;  %v218_v22 = vld [vmem:[%s918_s27 + $0x70] sm:$0xff]  ;;  %v219_v23 = vld [vmem:[%s918_s27 + $0x78] sm:$0xff]  ;;  %p658_p12 = pnand %p657_p13, %p1006_p1  ;;  %s660_s6 = sshll.u32 %s732_s29, 4  ;;  %s661_s6 = int_to_ptr.vmem [resolvable:$false] %s660_s6 }
  0x5a   : > { %v521_v21 = vpack.c.bf16 %v217_v20, %v216_v19  ;;  %v525_v24 = vpack.c.bf16 %v219_v23, %v218_v22  ;;  %v203_v25 = vld [vmem:[%s910_s19 + $0x8] sm:$0xff]  ;;  %s662_s7 = scalar_lea.vmem %s661_s6, 512  ;;  %p663_p5 = scmp.lt.s32.totalorder %s950_s8, %s661_s6 }
  0x5b   : > { %p659_p10 = pneg %p658_p12  ;;  %p664_p7 = scmp.lt.s32.totalorder %s662_s7, %s656_s13 }
  0x5c   : > { %504 = vmatpush3.bf16.msra.mxu0 %v501_v5 }
  0x5d   : > { %506 = vmatprep.subr.bf16.mxu0 %v505_v8  ;;  %p665_p9 = por %p664_p7, %p663_p5 }
  0x5f   : > { %p666_p11 = pnand %p665_p9, %p659_p10 }
  0x60   : > { %508 = vmatpush3.bf16.msra.mxu0 %v505_v8 }
  0x61   : > { %510 = vmatprep.subr.bf16.mxu0 %v509_v12 }
  0x64   : > { %512 = vmatpush3.bf16.msra.mxu0 %v509_v12 }
  0x65   : > { %514 = vmatprep.subr.bf16.mxu0 %v513_v15 }
  0x68   : > { %516 = vmatpush3.bf16.msra.mxu0 %v513_v15 }
  0x69   : > { %518 = vmatprep.subr.bf16.mxu0 %v517_v18 }
  0x6c   : > { %520 = vmatpush3.bf16.msra.mxu0 %v517_v18 }
  0x6d   : > { %522 = vmatprep.subr.bf16.mxu0 %v521_v21 }
  0x70   : > { %524 = vmatpush3.bf16.msra.mxu0 %v521_v21 }
  0x71   : > { %526 = vmatprep.subr.bf16.mxu0 %v525_v24 }
  0x74   : > { %528 = vmatpush3.bf16.msra.mxu0 %v525_v24 }
  0x77   : > { %495 = vmatmul.mubr.f32.vlgmr.msra.gmra.mrb[0].mxu0 %v203_v25 }
 0x14a   : > { %v496_v26 = vpop.f32.mrb[0].mxu0 }
 0x14b   : > { %584 = vtanh.f32 %v496_v26  ;;  %v286_v27 = vpop.f32.mrb[1].mxu0 }
 0x14c   : > { %586 = vtanh.f32 %v286_v27 }
 0x155   : > { %v585_v28 = vpop.eup %584 }
 0x156   : > { %v587_v29 = vpop.eup %586  ;;  %v299_v31 = vmul.f32 1.442695, %v585_v28 }
 0x157   : > { %v297_v30 = vmul.f32 1.442695, %v587_v29 }
 0x159   : > { %588 = vpow2.f32 %v297_v30 }
 0x15a   : > { %590 = vpow2.f32 %v299_v31 }
 0x163   : > { %v589_v32 = vpop.eup %588 }
 0x164   : > { %301 = vadd.xlane.f32.xlu0 %v589_v32  ;;  %v591_v33 = vpop.eup %590 }
 0x168   : > { %303 = vadd.xlane.f32.xlu0 %v591_v33 }
 0x1f1   : > { %v302_v34 = vpop.xlane.xlu0 %301 }
 0x1f2   : > { %592 = vrcp.f32 %v302_v34 }
 0x1f5   : > { %v304_v35 = vpop.xlane.xlu0 %303 }
 0x1f6   : > { %594 = vrcp.f32 %v304_v35 }
 0x1fc   : > { %v593_v36 = vpop.eup %592 }
 0x1fd   : > { %v307_v37 = vmul.f32 %v593_v36, %v589_v32 }
 0x1ff   : > { %v309_v38 = vmul.f32 %v307_v37, %v202_v9 }
 0x200   : > { %v595_v39 = vpop.eup %594 }
 0x201   : > { %v308_v40 = vmul.f32 %v595_v39, %v591_v33  ;;  %311 = vst [vmem:[%s201_s5] sm:$0xff] %v309_v38 }
 0x203   : > { %v310_v41 = vmul.f32 %v308_v40, %v203_v25 }
 0x205   : > { %312 = vst [vmem:[%s201_s5 + $0x8] sm:$0xff] %v310_v41 }
 0x206   : > { %669 = shalt.err (!%p666_p11)
}
 0x207   : > { %s670_s14 = scalar_lea.hbm %s948_s24, 256  ;;  %s674_s3 = scalar_lea.hbm %s996_s2, 512 }
 0x208   : > { %p671_p3 = scmp.ne.s32.totalorder %s948_s24, %s670_s14  ;;  %p675_p2 = scmp.lt.u32.totalorder %s948_s24, %s996_s2 }
 0x209   : > { %p676_p4 = scmp.lt.u32.totalorder %s674_s3, %s670_s14  ;;  %p678_p13 = scmp.lt.u32.totalorder %s670_s14, %s948_s24 }
 0x20a   : > { %p672_p8 = pnand %p671_p3, %p1006_p1 }
 0x20b   : > { %p677_p6 = por %p676_p4, %p675_p2 }
 0x20c   : > { %p673_p0 = pneg %p672_p8 }
 0x20d   : > { %p679_p12 = por %p678_p13, %p677_p6 }
 0x20f   : > { %p680_p10 = pnand %p679_p12, %p673_p0 }
 0x211   : > { %683 = shalt.err (!%p680_p10)
}
 0x212   : > { %s733_s26 = smov 128   ;;  %s734_s27 = smov 8  }
 0x213   : > { %533 = dma.vmem_to_hbm [thread:$0]  (%p1006_p1), %s950_s8, 256, %s948_s24, %s314_s25, %s733_s26, %s733_s26, %s734_s27  }
 0x214 PF: > { %s342_s20 = sand.u32 1, %s714_s9   ;;  %p1007_p5 = scmp.ne.s32.totalorder %s1002_s22, 0 }
 0x215   : > { %p1008_p7 = scmp.ge.s32.totalorder %s726_s12, 2  ;;  %s343_s5 = scalar_lea.sflag [#allocation4], %s342_s20 }
 0x217   : > { %p543_p9 = pnand %p1008_p7, %p1007_p5 }
 0x219   : > { %709 = dma.done.wait (!%p543_p9), %s343_s5, 256  }
 0x21a   : > { %711 = vsyncadd (!%p543_p9), %s343_s5, 4294967040  ;;  %p18_p11 = scmp.ge.s32.totalorder %s775_s15, 4   ;;  %s1009_s9 = smov %s718_s10 }
 0x21b   : > { %s1010_s10 = smov %s722_s11  ;;  %s1011_s11 = smov %s787_s18 }
 0x21c   : > { %s1012_s12 = smov %s775_s15  ;;  %20 = sbr.rel (!%p18_p11) target bundleno = 7 (0x7), region = 86 }
 0x223   :  { %348 = vsyncpa [#allocation3], 1 }
 0x224   :  { %350 = vsyncpa [#allocation3 + $0x1], 1 }
 0x225   :  { %351 = vsyncpa [#allocation6], 1 }
 0x226   :  { %353 = vsyncpa [#allocation6 + $0x1], 1 }
 0x227   :  { %354 = vsyncpa [#allocation4], 1 }
 0x228   :  { %356 = vsyncpa [#allocation4 + $0x1], 1 }

</bundles_post_ra>
